<compile_context>
chip_gen: v5e
topology: v5e:2x2
jax: 0.10.0
libtpu: 0.0.40
codegen_flags: <defaults>
</compile_context>

<pallas_src>
import functools

import jax
import jax.numpy as jnp
from jax import lax
from jax.experimental import pallas as pl
from jax.experimental.pallas import tpu as pltpu


def _round_up(n, m):
    return ((n + m - 1) // m) * m


def _full_spec(shape):
    # whole-array block; block_shape equal to full array dims is always legal
    return pl.BlockSpec(tuple(shape), lambda: (0,) * len(shape))


# -----------------------------------------------------------------------------
# Single-step kernel: out = tanh(sum_k x_k @ W_k + b), lane-dense (B, Lp) store
# (per review this path is launch-bound; plain XLA would also be fine, but the
#  Pallas version avoids the XLA-side concat and keeps one fused epilogue).
# -----------------------------------------------------------------------------
def _make_affine_tanh_kernel(n):
    def kernel(*refs):
        xs, ws = refs[:n], refs[n:2 * n]
        b_ref, out_ref = refs[2 * n], refs[2 * n + 1]
        acc = jnp.dot(xs[0][...], ws[0][...], preferred_element_type=jnp.float32)
        for x, w in zip(xs[1:], ws[1:]):
            acc = acc + jnp.dot(x[...], w[...], preferred_element_type=jnp.float32)
        out_ref[...] = jnp.tanh(acc + b_ref[...]).astype(out_ref.dtype)
    return kernel


def _fused_affine_tanh(xs, ws, b):
    n = len(xs)
    B = xs[0].shape[0]
    Lp = b.shape[-1]
    flops = sum(2 * B * int(x.shape[-1]) * Lp for x in xs)
    bytes_accessed = 4 * (sum(int(x.size) for x in xs)
                          + sum(int(w.size) for w in ws) + int(b.size) + B * Lp)
    return pl.pallas_call(
        _make_affine_tanh_kernel(n),
        out_shape=jax.ShapeDtypeStruct((B, Lp), jnp.float32),
        grid=(),
        in_specs=([_full_spec(x.shape) for x in xs]
                  + [_full_spec(w.shape) for w in ws]
                  + [_full_spec(b.shape)]),
        out_specs=_full_spec((B, Lp)),
        cost_estimate=pl.CostEstimate(flops=flops, transcendentals=B * Lp,
                                      bytes_accessed=bytes_accessed),
    )(*xs, *ws, b)


@functools.partial(jax.jit, static_argnames=("latent_dim",))
def obtain_initial_call(state, w_init, b_init, *, latent_dim):
    return _fused_affine_tanh([state], [w_init], b_init)[:, :latent_dim]


@functools.partial(jax.jit, static_argnames=("latent_dim",))
def infer_prior_call(last_post, action, w_pl, w_pa, b_p, *, latent_dim):
    # prior-only slab: no zeros-state feed, no dead K-block, no posterior head
    return _fused_affine_tanh([last_post, action], [w_pl, w_pa], b_p)[:, :latent_dim]


@functools.partial(jax.jit, static_argnames=("latent_dim",))
def infer_prior_posterior_call(last_post, state, action, w_z, w_s, w_a, b_step,
                               *, latent_dim):
    # three refs -> three accumulating dots in-kernel (no XLA-side concat);
    # output columns: [posterior (L) | prior (L) | zero pad] -> free slices.
    out = _fused_affine_tanh([last_post, state, action], [w_z, w_s, w_a], b_step)
    return out[:, latent_dim:2 * latent_dim], out[:, :latent_dim]


# -----------------------------------------------------------------------------
# Fused T-step rollout: chunked grid, in-kernel serial recurrence.
# -----------------------------------------------------------------------------
def _rollout_kernel(z0_ref, s_ref, a_ref, wz_ref, ws_ref, wa_ref, b_ref,
                    out_ref, u_scratch, z_carry, *, chunk_t, batch, unroll):
    @pl.when(pl.program_id(0) == 0)
    def _():
        z_carry[...] = z0_ref[...]                   # lane-dense (B, Lp) carry

    # ---- parallel pre-pass: project inputs for the whole chunk -------------
    S = s_ref.shape[-1]
    A = a_ref.shape[-1]
    s2 = s_ref[...].reshape(chunk_t * batch, S)      # B is a sublane multiple
    a2 = a_ref[...].reshape(chunk_t * batch, A)
    u = jnp.dot(s2, ws_ref[...], preferred_element_type=jnp.float32)
    u = u + jnp.dot(a2, wa_ref[...], preferred_element_type=jnp.float32)
    u_scratch[...] = u + b_ref[...]                  # (chunk_t*B, Lp)

    # ---- serial recurrence: one MXU dot + one tanh per step ----------------
    wz = wz_ref[...]                                 # (Lp, Lp), rows L:Lp == 0

    def body(i, z):
        row = pl.multiple_of(i * batch, batch)
        u_i = u_scratch[pl.ds(row, batch), :]
        y = jnp.tanh(jnp.dot(z, wz, preferred_element_type=jnp.float32) + u_i)
        out_ref[i] = y.astype(out_ref.dtype)         # [posterior | prior | pad]
        return y                                     # full lane-dense carry

    z_carry[...] = lax.fori_loop(0, chunk_t, body, z_carry[...], unroll=unroll)


# Sequence bytes per step at these widths are ~10 KB (s + a + out + u scratch),
# so 256 steps/chunk stays a few MiB -- fits v5e's 16 MiB default scoped VMEM
# and v7x's 32 MiB default with large headroom.
_CHUNK_T_MAX = 256


@functools.partial(jax.jit, static_argnames=("latent_dim",))
def rollout_call(z0, states, actions, w_z_pad, w_s, w_a, b_step, *, latent_dim):
    T, B, S = states.shape
    A = actions.shape[-1]
    Lp = b_step.shape[-1]
    L = latent_dim

    # Pad batch to a sublane multiple and the carry lanes to Lp (lane-dense).
    B_pad = _round_up(max(B, 8), 8)
    z0p = jnp.zeros((B_pad, Lp), jnp.float32).at[:B, :L].set(z0)
    if B_pad != B:
        states = jnp.pad(states, ((0, 0), (0, B_pad - B), (0, 0)))
        actions = jnp.pad(actions, ((0, 0), (0, B_pad - B), (0, 0)))

    chunk_t = min(T, _CHUNK_T_MAX)
    T_pad = _round_up(T, chunk_t)
    if T_pad != T:  # pad steps sit after all real steps -> carry corruption moot
        states = jnp.pad(states, ((0, T_pad - T), (0, 0), (0, 0)))
        actions = jnp.pad(actions, ((0, T_pad - T), (0, 0), (0, 0)))
    num_chunks = T_pad // chunk_t

    kernel = functools.partial(_rollout_kernel, chunk_t=chunk_t, batch=B_pad,
                               unroll=chunk_t <= 16)
    out = pl.pallas_call(
        kernel,
        out_shape=jax.ShapeDtypeStruct((T_pad, B_pad, Lp), jnp.float32),
        grid=(num_chunks,),
        in_specs=[
            pl.BlockSpec((B_pad, Lp), lambda c: (0, 0)),           # z0 (chunk 0)
            pl.BlockSpec((chunk_t, B_pad, S), lambda c: (c, 0, 0)),  # state chunk
            pl.BlockSpec((chunk_t, B_pad, A), lambda c: (c, 0, 0)),  # action chunk
            pl.BlockSpec((Lp, Lp), lambda c: (0, 0)),              # W_z (resident)
            pl.BlockSpec((S, Lp), lambda c: (0, 0)),               # W_s (resident)
            pl.BlockSpec((A, Lp), lambda c: (0, 0)),               # W_a (resident)
            pl.BlockSpec((1, Lp), lambda c: (0, 0)),               # bias (resident)
        ],
        out_specs=pl.BlockSpec((chunk_t, B_pad, Lp), lambda c: (c, 0, 0)),
        scratch_shapes=[pltpu.VMEM((chunk_t * B_pad, Lp), jnp.float32),  # u
                        pltpu.VMEM((B_pad, Lp), jnp.float32)],           # z carry
        compiler_params=pltpu.CompilerParams(
            dimension_semantics=("arbitrary",)),
        cost_estimate=pl.CostEstimate(
            flops=2 * T_pad * B_pad * (S + A + Lp) * Lp,
            transcendentals=T_pad * B_pad * Lp,
            bytes_accessed=4 * (T_pad * B_pad * (S + A + Lp)
                                + (Lp + S + A + 1) * Lp + B_pad * Lp),
        ),
    )(z0p, states, actions, w_z_pad, w_s, w_a, b_step)

    out = out[:T, :B]
    return out[:, :, L:2 * L], out[:, :, :L]          # (priors, posteriors)


# -----------------------------------------------------------------------------
# Module-equivalent wrapper (mirrors AbstractLatentModel.forward exactly)
# -----------------------------------------------------------------------------
class LatentModel:
    def __init__(self, state_dim, action_dim, latent_dim, key):
        self.latent_dim = latent_dim
        S, A, L = state_dim, action_dim, latent_dim
        Lp = _round_up(max(2 * L, 128), 128)          # lane-dense padded width
        ks = jax.random.split(key, 6)
        scale = 0.1
        raw = {
            # obtain_initial
            "w_is": scale * jax.random.normal(ks[0], (S, L), jnp.float32),
            "b_i":  jnp.zeros((1, L), jnp.float32),
            # infer_prior
            "w_pl": scale * jax.random.normal(ks[1], (L, L), jnp.float32),
            "w_pa": scale * jax.random.normal(ks[2], (A, L), jnp.float32),
            "b_p":  jnp.zeros((1, L), jnp.float32),
            # infer_posterior
            "w_ql": scale * jax.random.normal(ks[3], (L, L), jnp.float32),
            "w_qs": scale * jax.random.normal(ks[4], (S, L), jnp.float32),
            "w_qa": scale * jax.random.normal(ks[5], (A, L), jnp.float32),
            "b_q":  jnp.zeros((1, L), jnp.float32),
        }
        self.raw = raw
        z = jnp.zeros

        # Fused step slab, column layout [posterior (L) | prior (L) | zero pad],
        # split by input (row-slices) so kernels never need an activation concat.
        w_z = z((L, Lp), jnp.float32).at[:, :L].set(raw["w_ql"]) \
                                     .at[:, L:2 * L].set(raw["w_pl"])
        w_s = z((S, Lp), jnp.float32).at[:, :L].set(raw["w_qs"])   # prior cols: 0
        w_a = z((A, Lp), jnp.float32).at[:, :L].set(raw["w_qa"]) \
                                     .at[:, L:2 * L].set(raw["w_pa"])
        b_step = z((1, Lp), jnp.float32).at[:, :L].set(raw["b_q"]) \
                                        .at[:, L:2 * L].set(raw["b_p"])
        # Lane-dense recurrent weight: rows L:Lp == 0 so the carried prior/pad
        # lanes of y contribute nothing (carry can stay a full 128-lane vreg).
        w_z_pad = z((Lp, Lp), jnp.float32).at[:L, :].set(w_z)

        self.params = {
            "w_init": z((S, Lp), jnp.float32).at[:, :L].set(raw["w_is"]),
            "b_init": z((1, Lp), jnp.float32).at[:, :L].set(raw["b_i"]),
            "w_z": w_z, "w_s": w_s, "w_a": w_a, "b_step": b_step,
            "w_z_pad": w_z_pad,
            # prior-only slab for infer_prior (prior weights in lanes 0:L)
            "w_prior_l": z((L, Lp), jnp.float32).at[:, :L].set(raw["w_pl"]),
            "w_prior_a": z((A, Lp), jnp.float32).at[:, :L].set(raw["w_pa"]),
            "b_prior":   z((1, Lp), jnp.float32).at[:, :L].set(raw["b_p"]),
        }

    # --- abstract-method equivalents ----------------------------------------
    def obtain_initial(self, state, global_belief=None):
        return obtain_initial_call(state, self.params["w_init"],
                                   self.params["b_init"],
                                   latent_dim=self.latent_dim)

    def infer_prior(self, last_latent, action=None, global_belief=None):
        p = self.params
        return infer_prior_call(last_latent, action, p["w_prior_l"],
                                p["w_prior_a"], p["b_prior"],
                                latent_dim=self.latent_dim)

    def infer_posterior(self, last_latent, state, action=None, global_belief=None):
        p = self.params
        _, post = infer_prior_posterior_call(
            last_latent, state, action, p["w_z"], p["w_s"], p["w_a"],
            p["b_step"], latent_dim=self.latent_dim)
        return post

    # --- mirrors AbstractLatentModel.forward ---------------------------------
    def forward(self, last_latent_prior, last_latent_posterior, state, action,
                global_belief=None):
        if last_latent_prior is None:
            return self.obtain_initial(state, global_belief=global_belief), None
        p = self.params
        prior, posterior = infer_prior_posterior_call(
            last_latent_posterior, state, action, p["w_z"], p["w_s"], p["w_a"],
            p["b_step"], latent_dim=self.latent_dim)
        return prior, posterior

    # --- fused multi-step rollout (weights resident, in-kernel recurrence) ---
    def rollout(self, initial_posterior, states, actions):
        p = self.params
        return rollout_call(initial_posterior, states, actions,
                            p["w_z_pad"], p["w_s"], p["w_a"], p["b_step"],
                            latent_dim=self.latent_dim)


# -----------------------------------------------------------------------------
# Verification
# -----------------------------------------------------------------------------
if __name__ == "__main__":
    key = jax.random.PRNGKey(0)
    k_model, k_s, k_a, k_ss, k_as = jax.random.split(key, 5)

    B, S, A, L, T = 8, 32, 16, 32, 6
    model = LatentModel(state_dim=S, action_dim=A, latent_dim=L, key=k_model)

    state = jax.random.normal(k_s, (B, S), jnp.float32)
    action = jax.random.normal(k_a, (B, A), jnp.float32)

    # Branch 1: no previous latent -> obtain_initial
    init_latent, none_out = model.forward(None, None, state, action)
    init_latent = jax.block_until_ready(init_latent)
    assert none_out is None

    # Branch 2: previous latents present -> (prior, posterior)
    prior, posterior = jax.block_until_ready(
        model.forward(init_latent, init_latent, state, action))

    # Pure-JAX reference on the un-fused weights
    r = model.raw
    ref_init = jnp.tanh(state @ r["w_is"] + r["b_i"])
    ref_prior = jnp.tanh(init_latent @ r["w_pl"] + action @ r["w_pa"] + r["b_p"])
    ref_post = jnp.tanh(init_latent @ r["w_ql"] + state @ r["w_qs"]
                        + action @ r["w_qa"] + r["b_q"])
    assert init_latent.shape == (B, L)
    assert prior.shape == (B, L) and posterior.shape == (B, L)
    assert jnp.allclose(init_latent, ref_init, atol=1e-5)
    assert jnp.allclose(prior, ref_prior, atol=1e-5)
    assert jnp.allclose(posterior, ref_post, atol=1e-5)

    # Individual abstract-method heads also match
    assert jnp.allclose(model.infer_prior(init_latent, action=action),
                        ref_prior, atol=1e-5)
    assert jnp.allclose(model.infer_posterior(init_latent, state, action=action),
                        ref_post, atol=1e-5)

    # Fused T-step rollout (single chunked invocation, in-kernel fori_loop)
    states_seq = jax.random.normal(k_ss, (T, B, S), jnp.float32)
    actions_seq = jax.random.normal(k_as, (T, B, A), jnp.float32)
    priors_seq, posts_seq = jax.block_until_ready(
        model.rollout(init_latent, states_seq, actions_seq))
    assert priors_seq.shape == (T, B, L) and posts_seq.shape == (T, B, L)

    zc = init_latent
    for t in range(T):
        s_t, a_t = states_seq[t], actions_seq[t]
        pr = jnp.tanh(zc @ r["w_pl"] + a_t @ r["w_pa"] + r["b_p"])
        po = jnp.tanh(zc @ r["w_ql"] + s_t @ r["w_qs"] + a_t @ r["w_qa"] + r["b_q"])
        assert jnp.allclose(priors_seq[t], pr, atol=1e-4)
        assert jnp.allclose(posts_seq[t], po, atol=1e-4)
        zc = po

    print("KERNEL_OK")
</pallas_src>

<mosaic_0001>
module attributes {stable_mosaic.version = 11 : i64} {
  func.func @kernel(%arg0: memref<8x32xf32, #tpu.memory_space<vmem>>, %arg1: memref<32x128xf32, #tpu.memory_space<vmem>>, %arg2: memref<1x128xf32, #tpu.memory_space<vmem>>, %arg3: memref<8x128xf32, #tpu.memory_space<vmem>>) attributes {dimension_semantics = [], scalar_prefetch = 0 : i64, scratch_operands = 0 : i64, tpu.core_type = #tpu.core_type<tc>} {
    %c0 = arith.constant 0 : index
    %c0_0 = arith.constant 0 : index
    %0 = vector.load %arg0[%c0, %c0_0] : memref<8x32xf32, #tpu.memory_space<vmem>>, vector<8x32xf32>
    %c0_1 = arith.constant 0 : index
    %c0_2 = arith.constant 0 : index
    %1 = vector.load %arg1[%c0_1, %c0_2] : memref<32x128xf32, #tpu.memory_space<vmem>>, vector<32x128xf32>
    %cst = arith.constant dense<0.000000e+00> : vector<8x128xf32>
    %2 = tpu.matmul %0, %1, %cst {dimension_numbers = #tpu.dot_dimension_numbers<[1], [0], [0], [1], [0, 0, 1, 1], [], []>} : vector<8x32xf32>, vector<32x128xf32>, vector<8x128xf32> -> vector<8x128xf32>
    %c0_3 = arith.constant 0 : index
    %c0_4 = arith.constant 0 : index
    %3 = vector.load %arg2[%c0_3, %c0_4] : memref<1x128xf32, #tpu.memory_space<vmem>>, vector<1x128xf32>
    %4 = vector.broadcast %3 : vector<1x128xf32> to vector<8x128xf32>
    %5 = arith.addf %2, %4 : vector<8x128xf32>
    %6 = math.tanh %5 : vector<8x128xf32>
    %c0_5 = arith.constant 0 : index
    %c0_6 = arith.constant 0 : index
    %7 = vector.load %arg3[%c0_5, %c0_6] : memref<8x128xf32, #tpu.memory_space<vmem>>, vector<8x128xf32>
    tpu.vector_store %arg3[%c0_5, %c0_6], %6 {strides = array<i32>} : memref<8x128xf32, #tpu.memory_space<vmem>>, vector<8x128xf32>,
    return
  }
}

</mosaic_0001>

<bundles_post_ra>
// kernel: obtain_initial_call.1
= control target key start
LH: loop header
LB: loop body
LE: loop exit
PB: predicated region body
PF: predicated region fallthrough
CT: control target
= control target key end

     0   :  { %8 = vsyncpa [#allocation3], 0  ;;  %s222_s0 = inlined_call_operand.hbm [shape: f32[8,32], index: 0, kind: input, shape index: {}]   ;;  %s223_s1 = inlined_call_operand.hbm [shape: f32[32,128], index: 1, kind: input, shape index: {}]   ;;  %s224_s2 = inlined_call_operand.vmem [shape: f32[1,128], index: 2, kind: input, shape index: {}]   ;;  %s225_s3 = inlined_call_operand.hbm [shape: f32[8,128], index: 3, kind: output, shape index: {}]  }
   0x1   :  { %9 = vsyncpa [#allocation6], 0 }
   0x2   :  { %10 = vsyncpa [#allocation4], 0  ;;  %s16_s14 = sshll.u32 %s222_s0, 4  ;;  %s185_s15 = smov [#allocation2]   ;;  %s17_s14 = int_to_ptr.hbm [resolvable:$true] %s16_s14 }
   0x3   :  { %s18_s16 = sshll.u32 %s185_s15, 4  ;;  %s26_s19 = sshll.u32 %s223_s1, 4  ;;  %s19_s16 = int_to_ptr.vmem [resolvable:$true] %s18_s16  ;;  %s27_s19 = int_to_ptr.hbm [resolvable:$true] %s26_s19 }
   0x4   :  { %21 = dma.hbm_to_vmem [thread:$0]  %s17_s14, 128, %s19_s16, [#allocation3]  }
   0x5   :  { %s186_s20 = smov [#allocation5]   ;;  %s187_s22 = smov 128  }
   0x6   :  { %s28_s21 = sshll.u32 %s186_s20, 4  ;;  %s188_s23 = smov 8   ;;  %s29_s21 = int_to_ptr.vmem [resolvable:$true] %s28_s21 }
   0x7   :  { %34 = dma.hbm_to_vmem [thread:$0]  %s27_s19, 512, %s29_s21, [#allocation6], %s187_s22, %s187_s22, %s188_s23  }
   0x8   :  { %179 = dma.done.wait [#allocation3], 128  }
   0x9   :  { %180 = vsyncadd [#allocation3], 4294967168 }
   0xa   :  { %181 = dma.done.wait [#allocation6], 512  }
   0xb   :  { %182 = vsyncadd [#allocation6], 4294966784  ;;  %v49_v0 = vld [vmem:[#allocation5 + $0x18] sm:$0xff]  ;;  %v48_v1 = vld [vmem:[#allocation5 + $0x10] sm:$0xff]  ;;  %vm54_vm0 = vcmask 261120   ;;  %s189_s24 = smov [#allocation7]  }
   0xc   :  { %70 = vmatpush.msra.mxu0 %v49_v0  ;;  %v47_v2 = vld [vmem:[#allocation5 + $0x8] sm:$0xff]  ;;  %v46_v3 = vld [vmem:[#allocation5] sm:$0xff]  ;;  %v45_v4 = vld [vmem:[#allocation2] sm:$0xff]  ;;  %s85_s25 = sshll.u32 %s189_s24, 4  ;;  %s87_s28 = sshll.u32 %s225_s3, 4  ;;  %s86_s25 = int_to_ptr.vmem [resolvable:$true] %s85_s25  ;;  %s88_s28 = int_to_ptr.hbm [resolvable:$true] %s87_s28 }
   0xd   :  { %v104_v5 = vld [vmem:[%s224_s2] ss:$0 sm:$0xff] }
   0xe   :  { %71 = vmatpush.msra.mxu0 %v48_v1 }
  0x10   :  { %72 = vmatpush.msra.mxu0 %v47_v2 }
  0x12   :  { %73 = vmatpush.msra.mxu0 %v46_v3 }
  0x13   :  { %98 = vmatmul.msk.f32.vlgmr.msra.gmra.mxu0 %vm54_vm0, %v45_v4 }
  0x90   :  { %v75_v6 = vpop.f32.mrf.mxu0 }
  0x91   :  { %v76_v7 = vadd.f32 %v104_v5, %v75_v6 }
  0x93   :  { %105 = vtanh.f32 %v76_v7 }
  0x99   :  { %v106_v8 = vpop.eup %105 }
  0x9a   :  { %79 = vst [vmem:[#allocation7] sm:$0xff] %v106_v8 }
  0x9b   :  { %90 = dma.vmem_to_hbm [thread:$0]  %s86_s25, 128, %s88_s28, [#allocation4]  }
  0x9c   :  { %183 = dma.done.wait [#allocation4], 128  }
  0x9d   :  { %184 = vsyncadd [#allocation4], 4294967168 }
  0x9e   :  { %95 = vsyncpa [#allocation3], 1 }
  0x9f   :  { %96 = vsyncpa [#allocation6], 1 }
  0xa0   :  { %97 = vsyncpa [#allocation4], 1 }

</bundles_post_ra>
